<compile_context>
chip_gen: v5e
topology: v5e:2x2
jax: 0.10.0
libtpu: 0.0.40
codegen_flags: <defaults>
</compile_context>

<pallas_src>
import functools
import math

import jax
import jax.numpy as jnp
from jax.experimental import pallas as pl
from jax.experimental.pallas import tpu as pltpu

HIDDEN = 256
_TB_MAX = 2048  # max batch rows per grid step (multiple of 16 for bf16 packing)


def _round_up(x, m):
    return ((x + m - 1) // m) * m


def _pick_tb(B):
    """Batch tile: large enough to amortize per-step overhead, small enough
    for VMEM, and (for big B) yielding >=2 grid steps for v7x's 2 cores."""
    if B <= 16:
        return B
    return min(_TB_MAX, _round_up(pl.cdiv(B, 2), 16))


def _transfer_mlp_kernel(x_ref,
                         w1_ref, b1_ref,
                         w2_ref, b2_ref,
                         w3_ref, b3_ref,
                         w4_ref, b4_ref,
                         o_ref):
    # Layer 1: concat([s, a]) done once in the wrapper -> single K=s+a dot.
    h = jnp.dot(x_ref[...], w1_ref[...], preferred_element_type=jnp.float32)
    h = jnp.maximum(h + b1_ref[...], 0.0)
    # Layers 2/3: bf16 MXU matmuls with f32 accumulation / f32 elementwise.
    h = jnp.dot(h.astype(jnp.bfloat16), w2_ref[...],
                preferred_element_type=jnp.float32)
    h = jnp.maximum(h + b2_ref[...], 0.0)
    h = jnp.dot(h.astype(jnp.bfloat16), w3_ref[...],
                preferred_element_type=jnp.float32)
    h = jnp.maximum(h + b3_ref[...], 0.0)
    # Head: zero-padded to a lane-dense 128-wide block; raw logits, bf16 out.
    out = jnp.dot(h.astype(jnp.bfloat16), w4_ref[...],
                  preferred_element_type=jnp.float32)
    o_ref[...] = (out + b4_ref[...]).astype(o_ref.dtype)


def prepare_transfer_net_params(params):
    """One-time parameter preprocessing -- call once at init, not per step."""
    w1, b1, w2, b2, w3, b3, w4, b4 = params
    out_dim = w4.shape[1]                  # s_dim + 1
    out_pad = _round_up(out_dim, 128)      # lane-dense head width
    w1b = w1.astype(jnp.bfloat16)
    w2b = w2.astype(jnp.bfloat16)
    w3b = w3.astype(jnp.bfloat16)
    w4p = jnp.zeros((HIDDEN, out_pad), jnp.bfloat16).at[:, :out_dim].set(
        w4.astype(jnp.bfloat16))
    b1r = b1.reshape(1, HIDDEN).astype(jnp.float32)
    b2r = b2.reshape(1, HIDDEN).astype(jnp.float32)
    b3r = b3.reshape(1, HIDDEN).astype(jnp.float32)
    b4p = jnp.zeros((1, out_pad), jnp.float32).at[:, :out_dim].set(
        b4.astype(jnp.float32))
    return (w1b, b1r, w2b, b2r, w3b, b3r, w4p, b4p)


def transfer_net_forward(s, a, prepared_params):
    """Pallas-backed TransferNet.forward -> (s2: (B, s_dim), d: (B,))."""
    B, s_dim = s.shape
    a_dim = a.shape[1]
    in_dim = s_dim + a_dim
    w1b, b1r, w2b, b2r, w3b, b3r, w4p, b4p = prepared_params
    out_pad = w4p.shape[1]

    # Concatenated input is only (s_dim+a_dim) bf16 bytes/row in HBM; far
    # cheaper than paying two tiny-K MXU launches inside the kernel.
    x = jnp.concatenate([s, a], axis=1).astype(jnp.bfloat16)

    tb = _pick_tb(B)
    grid = (pl.cdiv(B, tb),)

    def batch_map(i):
        return (i, 0)

    def const_map(i):  # same block every step -> weights stay VMEM-resident
        return (0, 0)

    in_specs = [
        pl.BlockSpec((tb, in_dim), batch_map),       # [s, a] tile
        pl.BlockSpec((in_dim, HIDDEN), const_map),   # W1
        pl.BlockSpec((1, HIDDEN), const_map),        # b1
        pl.BlockSpec((HIDDEN, HIDDEN), const_map),   # W2
        pl.BlockSpec((1, HIDDEN), const_map),        # b2
        pl.BlockSpec((HIDDEN, HIDDEN), const_map),   # W3
        pl.BlockSpec((1, HIDDEN), const_map),        # b3
        pl.BlockSpec((HIDDEN, out_pad), const_map),  # W4 (zero-padded)
        pl.BlockSpec((1, out_pad), const_map),       # b4 (zero-padded)
    ]

    flops = 2 * B * (in_dim * HIDDEN + 2 * HIDDEN * HIDDEN + HIDDEN * out_pad)
    bytes_accessed = (B * in_dim * 2                                    # x in
                      + (in_dim * HIDDEN + 2 * HIDDEN * HIDDEN
                         + HIDDEN * out_pad) * 2                        # weights
                      + (3 * HIDDEN + out_pad) * 4                      # biases
                      + B * out_pad * 2)                                # bf16 out

    out = pl.pallas_call(
        _transfer_mlp_kernel,
        out_shape=jax.ShapeDtypeStruct((B, out_pad), jnp.bfloat16),
        grid=grid,
        in_specs=in_specs,
        out_specs=pl.BlockSpec((tb, out_pad), batch_map),
        compiler_params=pltpu.CompilerParams(
            dimension_semantics=("parallel",),
            vmem_limit_bytes=32 * 1024 * 1024),
        cost_estimate=pl.CostEstimate(
            flops=flops, transcendentals=0, bytes_accessed=bytes_accessed),
    )(x, w1b, b1r, w2b, b2r, w3b, b3r, w4p, b4p)

    # Sigmoid only on the B termination logits (not the full padded tile).
    s2 = out[:, :s_dim].astype(jnp.float32)
    d = jax.nn.sigmoid(out[:, s_dim].astype(jnp.float32))
    return s2, d


def init_transfer_net_params(key, s_dim, a_dim):
    """Mimics torch.nn.Linear default init: U(-1/sqrt(fan_in), +1/sqrt(fan_in))."""
    d_in = s_dim + a_dim
    dims = [(d_in, HIDDEN), (HIDDEN, HIDDEN), (HIDDEN, HIDDEN), (HIDDEN, s_dim + 1)]
    params = []
    for fan_in, fan_out in dims:
        key, kw, kb = jax.random.split(key, 3)
        bound = 1.0 / math.sqrt(fan_in)
        w = jax.random.uniform(kw, (fan_in, fan_out), jnp.float32, -bound, bound)
        b = jax.random.uniform(kb, (fan_out,), jnp.float32, -bound, bound)
        params.extend([w, b])
    return tuple(params)


if __name__ == "__main__":
    key = jax.random.PRNGKey(0)
    s_dim, a_dim, batch = 16, 8, 8

    k1, k2, kp = jax.random.split(key, 3)
    s = jax.random.normal(k1, (batch, s_dim), jnp.float32)
    a = jax.random.normal(k2, (batch, a_dim), jnp.float32)
    params = init_transfer_net_params(kp, s_dim, a_dim)

    prepared = prepare_transfer_net_params(params)   # one-time prep
    forward = jax.jit(transfer_net_forward)

    s2, d = forward(s, a, prepared)
    jax.block_until_ready((s2, d))

    # Pure-JAX reference mirroring the kernel's dtype flow (bf16 matmuls with
    # f32 accumulation, bf16 logit output, f32 sigmoid on the last column).
    w1, b1, w2, b2, w3, b3, w4, b4 = params
    xb = jnp.concatenate([s, a], axis=1).astype(jnp.bfloat16)
    h = jnp.dot(xb, w1.astype(jnp.bfloat16), preferred_element_type=jnp.float32)
    h = jnp.maximum(h + b1, 0.0)
    h = jnp.dot(h.astype(jnp.bfloat16), w2.astype(jnp.bfloat16),
                preferred_element_type=jnp.float32)
    h = jnp.maximum(h + b2, 0.0)
    h = jnp.dot(h.astype(jnp.bfloat16), w3.astype(jnp.bfloat16),
                preferred_element_type=jnp.float32)
    h = jnp.maximum(h + b3, 0.0)
    o = jnp.dot(h.astype(jnp.bfloat16), w4.astype(jnp.bfloat16),
                preferred_element_type=jnp.float32) + b4
    o = o.astype(jnp.bfloat16).astype(jnp.float32)   # kernel emits bf16 logits
    s2_ref = o[:, :s_dim]
    d_ref = jax.nn.sigmoid(o[:, s_dim])

    assert s2.shape == (batch, s_dim) and d.shape == (batch,), (s2.shape, d.shape)
    assert jnp.allclose(s2, s2_ref, atol=2e-2, rtol=2e-2), (s2, s2_ref)
    assert jnp.allclose(d, d_ref, atol=2e-2, rtol=2e-2), (d, d_ref)

    print("KERNEL_OK")
</pallas_src>

<mosaic_0001>
module attributes {stable_mosaic.version = 11 : i64} {
  func.func @_transfer_mlp_kernel(%arg0: i32, %arg1: memref<8x24xbf16, #tpu.memory_space<vmem>>, %arg2: memref<24x256xbf16, #tpu.memory_space<vmem>>, %arg3: memref<1x256xf32, #tpu.memory_space<vmem>>, %arg4: memref<256x256xbf16, #tpu.memory_space<vmem>>, %arg5: memref<1x256xf32, #tpu.memory_space<vmem>>, %arg6: memref<256x256xbf16, #tpu.memory_space<vmem>>, %arg7: memref<1x256xf32, #tpu.memory_space<vmem>>, %arg8: memref<256x128xbf16, #tpu.memory_space<vmem>>, %arg9: memref<1x128xf32, #tpu.memory_space<vmem>>, %arg10: memref<8x128xbf16, #tpu.memory_space<vmem>>) attributes {dimension_semantics = [#tpu.dimension_semantics<parallel>], iteration_bounds = array<i64: 1>, scalar_prefetch = 0 : i64, scratch_operands = 0 : i64, tpu.core_type = #tpu.core_type<tc>, window_params = [{transform_indices = @transform_0, window_bounds = array<i64: 8, 24>}, {pipeline_mode = #tpu.pipeline_mode<synchronous>, transform_indices = @transform_1, window_bounds = array<i64: 24, 256>}, {pipeline_mode = #tpu.pipeline_mode<synchronous>, transform_indices = @transform_2, window_bounds = array<i64: 1, 256>}, {pipeline_mode = #tpu.pipeline_mode<synchronous>, transform_indices = @transform_3, window_bounds = array<i64: 256, 256>}, {pipeline_mode = #tpu.pipeline_mode<synchronous>, transform_indices = @transform_4, window_bounds = array<i64: 1, 256>}, {pipeline_mode = #tpu.pipeline_mode<synchronous>, transform_indices = @transform_5, window_bounds = array<i64: 256, 256>}, {pipeline_mode = #tpu.pipeline_mode<synchronous>, transform_indices = @transform_6, window_bounds = array<i64: 1, 256>}, {pipeline_mode = #tpu.pipeline_mode<synchronous>, transform_indices = @transform_7, window_bounds = array<i64: 256, 128>}, {pipeline_mode = #tpu.pipeline_mode<synchronous>, transform_indices = @transform_8, window_bounds = array<i64: 1, 128>}, {transform_indices = @transform_9, window_bounds = array<i64: 8, 128>}]} {
    %c0 = arith.constant 0 : index
    %c0_0 = arith.constant 0 : index
    %0 = vector.load %arg1[%c0, %c0_0] : memref<8x24xbf16, #tpu.memory_space<vmem>>, vector<8x24xbf16>
    %c0_1 = arith.constant 0 : index
    %c0_2 = arith.constant 0 : index
    %1 = vector.load %arg2[%c0_1, %c0_2] : memref<24x256xbf16, #tpu.memory_space<vmem>>, vector<24x256xbf16>
    %cst = arith.constant dense<0.000000e+00> : vector<8x256xf32>
    %2 = tpu.matmul %0, %1, %cst {dimension_numbers = #tpu.dot_dimension_numbers<[1], [0], [0], [1], [0, 0, 1, 1], [], []>} : vector<8x24xbf16>, vector<24x256xbf16>, vector<8x256xf32> -> vector<8x256xf32>
    %c0_3 = arith.constant 0 : index
    %c0_4 = arith.constant 0 : index
    %3 = vector.load %arg3[%c0_3, %c0_4] : memref<1x256xf32, #tpu.memory_space<vmem>>, vector<1x256xf32>
    %4 = vector.broadcast %3 : vector<1x256xf32> to vector<8x256xf32>
    %5 = arith.addf %2, %4 : vector<8x256xf32>
    %cst_5 = arith.constant 0.000000e+00 : f32
    %6 = vector.broadcast %cst_5 : f32 to vector<8x256xf32>
    %7 = arith.maximumf %5, %6 : vector<8x256xf32>
    %8 = arith.truncf %7 : vector<8x256xf32> to vector<8x256xbf16>
    %c0_6 = arith.constant 0 : index
    %c0_7 = arith.constant 0 : index
    %9 = vector.load %arg4[%c0_6, %c0_7] : memref<256x256xbf16, #tpu.memory_space<vmem>>, vector<256x256xbf16>
    %cst_8 = arith.constant dense<0.000000e+00> : vector<8x256xf32>
    %10 = tpu.matmul %8, %9, %cst_8 {dimension_numbers = #tpu.dot_dimension_numbers<[1], [0], [0], [1], [0, 0, 1, 1], [], []>} : vector<8x256xbf16>, vector<256x256xbf16>, vector<8x256xf32> -> vector<8x256xf32>
    %c0_9 = arith.constant 0 : index
    %c0_10 = arith.constant 0 : index
    %11 = vector.load %arg5[%c0_9, %c0_10] : memref<1x256xf32, #tpu.memory_space<vmem>>, vector<1x256xf32>
    %12 = vector.broadcast %11 : vector<1x256xf32> to vector<8x256xf32>
    %13 = arith.addf %10, %12 : vector<8x256xf32>
    %cst_11 = arith.constant 0.000000e+00 : f32
    %14 = vector.broadcast %cst_11 : f32 to vector<8x256xf32>
    %15 = arith.maximumf %13, %14 : vector<8x256xf32>
    %16 = arith.truncf %15 : vector<8x256xf32> to vector<8x256xbf16>
    %c0_12 = arith.constant 0 : index
    %c0_13 = arith.constant 0 : index
    %17 = vector.load %arg6[%c0_12, %c0_13] : memref<256x256xbf16, #tpu.memory_space<vmem>>, vector<256x256xbf16>
    %cst_14 = arith.constant dense<0.000000e+00> : vector<8x256xf32>
    %18 = tpu.matmul %16, %17, %cst_14 {dimension_numbers = #tpu.dot_dimension_numbers<[1], [0], [0], [1], [0, 0, 1, 1], [], []>} : vector<8x256xbf16>, vector<256x256xbf16>, vector<8x256xf32> -> vector<8x256xf32>
    %c0_15 = arith.constant 0 : index
    %c0_16 = arith.constant 0 : index
    %19 = vector.load %arg7[%c0_15, %c0_16] : memref<1x256xf32, #tpu.memory_space<vmem>>, vector<1x256xf32>
    %20 = vector.broadcast %19 : vector<1x256xf32> to vector<8x256xf32>
    %21 = arith.addf %18, %20 : vector<8x256xf32>
    %cst_17 = arith.constant 0.000000e+00 : f32
    %22 = vector.broadcast %cst_17 : f32 to vector<8x256xf32>
    %23 = arith.maximumf %21, %22 : vector<8x256xf32>
    %24 = arith.truncf %23 : vector<8x256xf32> to vector<8x256xbf16>
    %c0_18 = arith.constant 0 : index
    %c0_19 = arith.constant 0 : index
    %25 = vector.load %arg8[%c0_18, %c0_19] : memref<256x128xbf16, #tpu.memory_space<vmem>>, vector<256x128xbf16>
    %cst_20 = arith.constant dense<0.000000e+00> : vector<8x128xf32>
    %26 = tpu.matmul %24, %25, %cst_20 {dimension_numbers = #tpu.dot_dimension_numbers<[1], [0], [0], [1], [0, 0, 1, 1], [], []>} : vector<8x256xbf16>, vector<256x128xbf16>, vector<8x128xf32> -> vector<8x128xf32>
    %c0_21 = arith.constant 0 : index
    %c0_22 = arith.constant 0 : index
    %27 = vector.load %arg9[%c0_21, %c0_22] : memref<1x128xf32, #tpu.memory_space<vmem>>, vector<1x128xf32>
    %28 = vector.broadcast %27 : vector<1x128xf32> to vector<8x128xf32>
    %29 = arith.addf %26, %28 : vector<8x128xf32>
    %30 = arith.truncf %29 : vector<8x128xf32> to vector<8x128xbf16>
    %c0_23 = arith.constant 0 : index
    %c0_24 = arith.constant 0 : index
    %31 = vector.load %arg10[%c0_23, %c0_24] : memref<8x128xbf16, #tpu.memory_space<vmem>>, vector<8x128xbf16>
    tpu.vector_store %arg10[%c0_23, %c0_24], %30 {strides = array<i32>} : memref<8x128xbf16, #tpu.memory_space<vmem>>, vector<8x128xbf16>,
    return
  }
  func.func @transform_0(%arg0: i32) -> (i32, i32) {
    %c0_i32 = arith.constant 0 : i32
    %c0_i32_0 = arith.constant 0 : i32
    return %arg0, %c0_i32 : i32, i32
  }
  func.func @transform_1(%arg0: i32) -> (i32, i32) {
    %c0_i32 = arith.constant 0 : i32
    %c0_i32_0 = arith.constant 0 : i32
    %c0_i32_1 = arith.constant 0 : i32
    return %c0_i32, %c0_i32_0 : i32, i32
  }
  func.func @transform_2(%arg0: i32) -> (i32, i32) {
    %c0_i32 = arith.constant 0 : i32
    %c0_i32_0 = arith.constant 0 : i32
    %c0_i32_1 = arith.constant 0 : i32
    return %c0_i32, %c0_i32_0 : i32, i32
  }
  func.func @transform_3(%arg0: i32) -> (i32, i32) {
    %c0_i32 = arith.constant 0 : i32
    %c0_i32_0 = arith.constant 0 : i32
    %c0_i32_1 = arith.constant 0 : i32
    return %c0_i32, %c0_i32_0 : i32, i32
  }
  func.func @transform_4(%arg0: i32) -> (i32, i32) {
    %c0_i32 = arith.constant 0 : i32
    %c0_i32_0 = arith.constant 0 : i32
    %c0_i32_1 = arith.constant 0 : i32
    return %c0_i32, %c0_i32_0 : i32, i32
  }
  func.func @transform_5(%arg0: i32) -> (i32, i32) {
    %c0_i32 = arith.constant 0 : i32
    %c0_i32_0 = arith.constant 0 : i32
    %c0_i32_1 = arith.constant 0 : i32
    return %c0_i32, %c0_i32_0 : i32, i32
  }
  func.func @transform_6(%arg0: i32) -> (i32, i32) {
    %c0_i32 = arith.constant 0 : i32
    %c0_i32_0 = arith.constant 0 : i32
    %c0_i32_1 = arith.constant 0 : i32
    return %c0_i32, %c0_i32_0 : i32, i32
  }
  func.func @transform_7(%arg0: i32) -> (i32, i32) {
    %c0_i32 = arith.constant 0 : i32
    %c0_i32_0 = arith.constant 0 : i32
    %c0_i32_1 = arith.constant 0 : i32
    return %c0_i32, %c0_i32_0 : i32, i32
  }
  func.func @transform_8(%arg0: i32) -> (i32, i32) {
    %c0_i32 = arith.constant 0 : i32
    %c0_i32_0 = arith.constant 0 : i32
    %c0_i32_1 = arith.constant 0 : i32
    return %c0_i32, %c0_i32_0 : i32, i32
  }
  func.func @transform_9(%arg0: i32) -> (i32, i32) {
    %c0_i32 = arith.constant 0 : i32
    %c0_i32_0 = arith.constant 0 : i32
    return %arg0, %c0_i32 : i32, i32
  }
}

</mosaic_0001>

<bundles_post_ra>
// kernel: transfer_net_forward.1
= control target key start
LH: loop header
LB: loop body
LE: loop exit
PB: predicated region body
PF: predicated region fallthrough
CT: control target
= control target key end

     0   :  { %14 = vsyncpa [#allocation3], 0  ;;  %s1417_s0 = inlined_call_operand.vmem [shape: bf16[8,24], index: 0, kind: input, shape index: {}]   ;;  %s1418_s1 = inlined_call_operand.vmem [shape: bf16[24,256], index: 1, kind: input, shape index: {}]   ;;  %s1419_s2 = inlined_call_operand.vmem [shape: f32[1,256], index: 2, kind: input, shape index: {}]   ;;  %s1420_s3 = inlined_call_operand.hbm [shape: bf16[256,256], index: 3, kind: input, shape index: {}]   ;;  %s1421_s4 = inlined_call_operand.vmem [shape: f32[1,256], index: 4, kind: input, shape index: {}]   ;;  %s1422_s5 = inlined_call_operand.hbm [shape: bf16[256,256], index: 5, kind: input, shape index: {}]   ;;  %s1423_s6 = inlined_call_operand.vmem [shape: f32[1,256], index: 6, kind: input, shape index: {}]   ;;  %s1424_s7 = inlined_call_operand.hbm [shape: bf16[256,128], index: 7, kind: input, shape index: {}]   ;;  %s1425_s8 = inlined_call_operand.vmem [shape: f32[1,128], index: 8, kind: input, shape index: {}]   ;;  %s1426_s9 = inlined_call_operand.vmem [shape: bf16[8,128], index: 9, kind: output, shape index: {}]  }
   0x1   :  { %15 = vsyncpa [#allocation5], 0  ;;  %s41_s11 = sshll.u32 %s1422_s5, 4  ;;  %s1316_s12 = smov [#allocation4]   ;;  %s42_s11 = int_to_ptr.hbm [resolvable:$true] %s41_s11 }
   0x2   :  { %s43_s13 = sshll.u32 %s1316_s12, 4  ;;  %s26_s16 = sshll.u32 %s1420_s3, 4  ;;  %s44_s13 = int_to_ptr.vmem [resolvable:$true] %s43_s13  ;;  %s27_s16 = int_to_ptr.hbm [resolvable:$true] %s26_s16 }
   0x3   :  { %s1317_s17 = smov 128   ;;  %s1318_s18 = smov 8  }
   0x4   :  { %49 = dma.hbm_to_vmem [thread:$0]  %s42_s11, 4096, %s44_s13, [#allocation5], %s1317_s17, %s1317_s17, %s1318_s18  }
   0x5   :  { %s1319_s19 = smov [#allocation2]   ;;  %s56_s23 = sshll.u32 %s1424_s7, 4  ;;  %s57_s23 = int_to_ptr.hbm [resolvable:$true] %s56_s23 }
   0x6   :  { %s28_s20 = sshll.u32 %s1319_s19, 4  ;;  %s1320_s5 = smov [#allocation6]   ;;  %s29_s20 = int_to_ptr.vmem [resolvable:$true] %s28_s20 }
   0x7   :  { %34 = dma.hbm_to_vmem [thread:$0]  %s27_s16, 4096, %s29_s20, [#allocation3], %s1317_s17, %s1317_s17, %s1318_s18  }
   0x8   :  { %s58_s24 = sshll.u32 %s1320_s5, 4  ;;  %s1321_s25 = smov 64   ;;  %s59_s24 = int_to_ptr.vmem [resolvable:$true] %s58_s24 }
   0x9   :  { %s1322_s26 = smov 4  }
   0xa   :  { %64 = dma.hbm_to_vmem [thread:$0]  %s57_s23, 2048, %s59_s24, [#allocation5], %s1321_s25, %s1321_s25, %s1322_s26  }
   0xb   :  { %1312 = dma.done.wait [#allocation3], 4096  }
   0xc   :  { %1313 = vsyncadd [#allocation3], 4294963200 }
   0xd   :  { %1314 = dma.done.wait [#allocation5], 6144  }
   0xe   :  { %1315 = vsyncadd [#allocation5], 4294961152  ;;  %v83_v0 = vld [vmem:[%s1418_s1 + $0x10] sm:$0xff]  ;;  %vm109_vm0 = vcmask 1043456   ;;  %v822_v3 = vld [vmem:[%s1418_s1] sm:$0xf] }
   0xf   :  { %v97_v1 = vunpack.c.l.b16 %v83_v0  ;;  %v98_v2 = vunpack.c.h.b16 %v83_v0  ;;  %v1151_v4 = vld [vmem:[%s1418_s1 + $0x4] sm:$0xf0]  ;;  %v1150_v5 = vld [vmem:[%s1418_s1 + $0x4] sm:$0xf]  ;;  %v824_v6 = vld [vmem:[%s1418_s1 + $0x8] sm:$0xf0] }
  0x10   :  { %v888_v7 = vld [vmem:[#allocation2 + $0x70] sm:$0xf]  ;;  %v1167_v8 = vld [vmem:[#allocation2 + $0x74] sm:$0xf0]  ;;  %v1166_v14 = vld [vmem:[#allocation2 + $0x74] sm:$0xf]  ;;  %v823_v24 = vor.u32 %v1151_v4, %v822_v3  ;;  %v827_v25 = vor.u32 %v1150_v5, %v824_v6 }
  0x11   :  { %v952_v9 = vld [vmem:[#allocation2 + $0xf0] sm:$0xf]  ;;  %v101_v10 = vpack.c.b16 %v97_v1, %v97_v1  ;;  %v102_v11 = vpack.c.b16 %v98_v2, %v98_v2  ;;  %v889_v12 = vor.u32 %v1167_v8, %v888_v7  ;;  %v1183_v13 = vld [vmem:[#allocation2 + $0xf4] sm:$0xf0]  ;;  %v890_v15 = vld [vmem:[#allocation2 + $0x78] sm:$0xf0] }
  0x12   :  { %v953_v16 = vor.u32 %v1183_v13, %v952_v9  ;;  %v1182_v17 = vld [vmem:[#allocation2 + $0xf4] sm:$0xf]  ;;  %v954_v18 = vld [vmem:[#allocation2 + $0xf8] sm:$0xf0]  ;;  %v880_v19 = vld [vmem:[#allocation2 + $0x60] sm:$0xf]  ;;  %v893_v28 = vor.u32 %v1166_v14, %v890_v15 }
  0x13   :  { %v111_v20 = vsel %vm109_vm0, %v101_v10, 0  ;;  %v114_v21 = vsel %vm109_vm0, %v102_v11, 0  ;;  %344 = vmatpush.bf16.msra.mxu2 %v889_v12  ;;  %v1165_v22 = vld [vmem:[#allocation2 + $0x64] sm:$0xf0]  ;;  %v944_v23 = vld [vmem:[#allocation2 + $0xe0] sm:$0xf]  ;;  %v957_v29 = vor.u32 %v1182_v17, %v954_v18 }
  0x14   :  { %122 = vmatpush.bf16.msra.mxu0 %v111_v20  ;;  %135 = vmatpush.bf16.msra.mxu1 %v114_v21  ;;  %v881_v26 = vor.u32 %v1165_v22, %v880_v19  ;;  %v1181_v27 = vld [vmem:[#allocation2 + $0xe4] sm:$0xf0]  ;;  %v1164_v30 = vld [vmem:[#allocation2 + $0x64] sm:$0xf]  ;;  %v882_v31 = vld [vmem:[#allocation2 + $0x68] sm:$0xf0] }
  0x15   :  { %357 = vmatpush.bf16.msra.mxu3 %v953_v16  ;;  %v872_v32 = vld [vmem:[#allocation2 + $0x50] sm:$0xf]  ;;  %v945_v33 = vor.u32 %v1181_v27, %v944_v23  ;;  %v1180_v34 = vld [vmem:[#allocation2 + $0xe4] sm:$0xf]  ;;  %v946_v35 = vld [vmem:[#allocation2 + $0xe8] sm:$0xf0]  ;;  %v885_v41 = vor.u32 %v1164_v30, %v882_v31 }
  0x16   :  { %v1163_v36 = vld [vmem:[#allocation2 + $0x54] sm:$0xf0]  ;;  %v936_v37 = vld [vmem:[#allocation2 + $0xd0] sm:$0xf]  ;;  %v80_v39 = vld [vmem:[%s1417_s0] sm:$0xf]  ;;  %v949_v42 = vor.u32 %v1180_v34, %v946_v35 }
  0x17   :  { %345 = vmatpush.bf16.msra.mxu2 %v881_v26  ;;  %v1179_v38 = vld [vmem:[#allocation2 + $0xd4] sm:$0xf0]  ;;  %vm105_vm1 = vcmask 195584   ;;  %v873_v40 = vor.u32 %v1163_v36, %v872_v32  ;;  %v1162_v43 = vld [vmem:[#allocation2 + $0x54] sm:$0xf] }
  0x18   :  { %123 = vmatpush.bf16.msra.mxu0 %v823_v24  ;;  %136 = vmatpush.bf16.msra.mxu1 %v827_v25  ;;  %v864_v44 = vld [vmem:[#allocation2 + $0x40] sm:$0xf]  ;;  %v1161_v45 = vld [vmem:[#allocation2 + $0x44] sm:$0xf0]  ;;  %v937_v46 = vor.u32 %v1179_v38, %v936_v37  ;;  %v874_v47 = vld [vmem:[#allocation2 + $0x58] sm:$0xf0] }
  0x19   :  { %358 = vmatpush.bf16.msra.mxu3 %v945_v33  ;;  %v1178_v48 = vld [vmem:[#allocation2 + $0xd4] sm:$0xf]  ;;  %v938_v49 = vld [vmem:[#allocation2 + $0xd8] sm:$0xf0]  ;;  %v928_v50 = vld [vmem:[#allocation2 + $0xc0] sm:$0xf]  ;;  %v865_v52 = vor.u32 %v1161_v45, %v864_v44  ;;  %v877_v53 = vor.u32 %v1162_v43, %v874_v47 }
  0x1a   :  { %v1177_v51 = vld [vmem:[#allocation2 + $0xc4] sm:$0xf0]  ;;  %v941_v54 = vor.u32 %v1178_v48, %v938_v49  ;;  %v1160_v55 = vld [vmem:[#allocation2 + $0x44] sm:$0xf]  ;;  %v856_v56 = vld [vmem:[#allocation2 + $0x30] sm:$0xf] }
  0x1b   :  { %828 = vmatmul.msk.bf16.vlgmr.msra.gmra.mxu0 %vm105_vm1, %v80_v39  ;;  %829 = vmatmul.msk.bf16.vlgmr.msra.gmra.mxu1 %vm105_vm1, %v80_v39  ;;  %v1159_v57 = vld [vmem:[#allocation2 + $0x34] sm:$0xf0]  ;;  %v929_v58 = vor.u32 %v1177_v51, %v928_v50  ;;  %v866_v59 = vld [vmem:[#allocation2 + $0x48] sm:$0xf0]  ;;  %v1176_v60 = vld [vmem:[#allocation2 + $0xc4] sm:$0xf] }
  0x1c   :  { %370 = vmatpush.bf16.msrb.mxu0 %v893_v28  ;;  %383 = vmatpush.bf16.msrb.mxu1 %v957_v29  ;;  %v930_v61 = vld [vmem:[#allocation2 + $0xc8] sm:$0xf0]  ;;  %v920_v62 = vld [vmem:[#allocation2 + $0xb0] sm:$0xf]  ;;  %v1175_v63 = vld [vmem:[#allocation2 + $0xb4] sm:$0xf0]  ;;  %v857_v0 = vor.u32 %v1159_v57, %v856_v56  ;;  %v869_v1 = vor.u32 %v1160_v55, %v866_v59 }
  0x1d   :  { %346 = vmatpush.bf16.msra.mxu2 %v873_v40  ;;  %359 = vmatpush.bf16.msra.mxu3 %v937_v46  ;;  %v933_v2 = vor.u32 %v1176_v60, %v930_v61  ;;  %v1158_v3 = vld [vmem:[#allocation2 + $0x34] sm:$0xf]  ;;  %v848_v4 = vld [vmem:[#allocation2 + $0x20] sm:$0xf]  ;;  %v1157_v5 = vld [vmem:[#allocation2 + $0x24] sm:$0xf0]  ;;  %v921_v6 = vor.u32 %v1175_v63, %v920_v62 }
  0x1e   :  { %v858_v7 = vld [vmem:[#allocation2 + $0x38] sm:$0xf0]  ;;  %v1174_v8 = vld [vmem:[#allocation2 + $0xb4] sm:$0xf]  ;;  %v912_v10 = vld [vmem:[#allocation2 + $0xa0] sm:$0xf]  ;;  %v849_v12 = vor.u32 %v1157_v5, %v848_v4 }
  0x1f   :  { %v922_v9 = vld [vmem:[#allocation2 + $0xb8] sm:$0xf0]  ;;  %v1173_v11 = vld [vmem:[#allocation2 + $0xa4] sm:$0xf0]  ;;  %v861_v13 = vor.u32 %v1158_v3, %v858_v7  ;;  %v1156_v15 = vld [vmem:[#allocation2 + $0x24] sm:$0xf] }
  0x20   :  { %371 = vmatpush.bf16.msrb.mxu0 %v885_v41  ;;  %384 = vmatpush.bf16.msrb.mxu1 %v949_v42  ;;  %v925_v14 = vor.u32 %v1174_v8, %v922_v9  ;;  %v913_v16 = vor.u32 %v1173_v11, %v912_v10  ;;  %v850_v17 = vld [vmem:[#allocation2 + $0x28] sm:$0xf0]  ;;  %v1172_v18 = vld [vmem:[#allocation2 + $0xa4] sm:$0xf]  ;;  %v840_v22 = vld [vmem:[#allocation2 + $0x10] sm:$0xf] }
  0x21   :  { %347 = vmatpush.bf16.msra.mxu2 %v865_v52  ;;  %360 = vmatpush.bf16.msra.mxu3 %v929_v58  ;;  %v914_v19 = vld [vmem:[#allocation2 + $0xa8] sm:$0xf0]  ;;  %v853_v20 = vor.u32 %v1156_v15, %v850_v17  ;;  %v1155_v23 = vld [vmem:[#allocation2 + $0x14] sm:$0xf0]  ;;  %v904_v24 = vld [vmem:[#allocation2 + $0x90] sm:$0xf] }
  0x22   :  { %v917_v21 = vor.u32 %v1172_v18, %v914_v19  ;;  %v841_v25 = vor.u32 %v1155_v23, %v840_v22  ;;  %v1171_v26 = vld [vmem:[#allocation2 + $0x94] sm:$0xf0]  ;;  %v1154_v27 = vld [vmem:[#allocation2 + $0x14] sm:$0xf]  ;;  %v842_v28 = vld [vmem:[#allocation2 + $0x18] sm:$0xf0] }
  0x23   :  { %v905_v29 = vor.u32 %v1171_v26, %v904_v24  ;;  %v845_v30 = vor.u32 %v1154_v27, %v842_v28  ;;  %v1170_v31 = vld [vmem:[#allocation2 + $0x94] sm:$0xf]  ;;  %v906_v32 = vld [vmem:[#allocation2 + $0x98] sm:$0xf0]  ;;  %v832_v34 = vld [vmem:[#allocation2] sm:$0xf] }
  0x24   :  { %372 = vmatpush.bf16.msrb.mxu0 %v877_v53  ;;  %385 = vmatpush.bf16.msrb.mxu1 %v941_v54  ;;  %v909_v33 = vor.u32 %v1170_v31, %v906_v32  ;;  %v1153_v35 = vld [vmem:[#allocation2 + $0x4] sm:$0xf0]  ;;  %v896_v36 = vld [vmem:[#allocation2 + $0x80] sm:$0xf]  ;;  %v1152_v39 = vld [vmem:[#allocation2 + $0x4] sm:$0xf] }
  0x25   :  { %348 = vmatpush.bf16.msra.mxu2 %v857_v0  ;;  %361 = vmatpush.bf16.msra.mxu3 %v921_v6  ;;  %v833_v37 = vor.u32 %v1153_v35, %v832_v34  ;;  %v1169_v38 = vld [vmem:[#allocation2 + $0x84] sm:$0xf0]  ;;  %v834_v40 = vld [vmem:[#allocation2 + $0x8] sm:$0xf0]  ;;  %v1168_v43 = vld [vmem:[#allocation2 + $0x84] sm:$0xf] }
  0x26   :  { %v897_v41 = vor.u32 %v1169_v38, %v896_v36  ;;  %v837_v42 = vor.u32 %v1152_v39, %v834_v40  ;;  %v898_v44 = vld [vmem:[#allocation2 + $0x88] sm:$0xf0]  ;;  %v1080_v46 = vld [vmem:[#allocation4 + $0xf0] sm:$0xf]  ;;  %v1215_v47 = vld [vmem:[#allocation4 + $0xf4] sm:$0xf0] }
  0x27   :  { %v901_v45 = vor.u32 %v1168_v43, %v898_v44  ;;  %v1214_v48 = vld [vmem:[#allocation4 + $0xf4] sm:$0xf]  ;;  %v1081_v49 = vor.u32 %v1215_v47, %v1080_v46  ;;  %v1082_v50 = vld [vmem:[#allocation4 + $0xf8] sm:$0xf0]  ;;  %v1072_v51 = vld [vmem:[#allocation4 + $0xe0] sm:$0xf] }
  0x28   :  { %373 = vmatpush.bf16.msrb.mxu0 %v869_v1  ;;  %386 = vmatpush.bf16.msrb.mxu1 %v933_v2  ;;  %v1213_v52 = vld [vmem:[#allocation4 + $0xe4] sm:$0xf0]  ;;  %v1085_v53 = vor.u32 %v1214_v48, %v1082_v50  ;;  %v1212_v54 = vld [vmem:[#allocation4 + $0xe4] sm:$0xf]  ;;  %v1074_v55 = vld [vmem:[#allocation4 + $0xe8] sm:$0xf0] }
  0x29   :  { %349 = vmatpush.bf16.msra.mxu2 %v849_v12  ;;  %362 = vmatpush.bf16.msra.mxu3 %v913_v16  ;;  %v1016_v56 = vld [vmem:[#allocation4 + $0x70] sm:$0xf]  ;;  %v1073_v57 = vor.u32 %v1213_v52, %v1072_v51  ;;  %v1199_v58 = vld [vmem:[#allocation4 + $0x74] sm:$0xf0]  ;;  %v1198_v59 = vld [vmem:[#allocation4 + $0x74] sm:$0xf]  ;;  %v1077_v61 = vor.u32 %v1212_v54, %v1074_v55 }
  0x2a   :  { %v1018_v60 = vld [vmem:[#allocation4 + $0x78] sm:$0xf0]  ;;  %v1017_v62 = vor.u32 %v1199_v58, %v1016_v56  ;;  %v1064_v0 = vld [vmem:[#allocation4 + $0xd0] sm:$0xf]  ;;  %v1211_v1 = vld [vmem:[#allocation4 + $0xd4] sm:$0xf0] }
  0x2b   :  { %v1021_v63 = vor.u32 %v1198_v59, %v1018_v60  ;;  %v1210_v2 = vld [vmem:[#allocation4 + $0xd4] sm:$0xf]  ;;  %v1066_v3 = vld [vmem:[#allocation4 + $0xd8] sm:$0xf0]  ;;  %v1008_v4 = vld [vmem:[#allocation4 + $0x60] sm:$0xf]  ;;  %v1065_v9 = vor.u32 %v1211_v1, %v1064_v0 }
  0x2c   :  { %374 = vmatpush.bf16.msrb.mxu0 %v861_v13  ;;  %387 = vmatpush.bf16.msrb.mxu1 %v925_v14  ;;  %v1197_v5 = vld [vmem:[#allocation4 + $0x64] sm:$0xf0]  ;;  %v1196_v7 = vld [vmem:[#allocation4 + $0x64] sm:$0xf]  ;;  %v1010_v8 = vld [vmem:[#allocation4 + $0x68] sm:$0xf0]  ;;  %v1069_v13 = vor.u32 %v1210_v2, %v1066_v3 }
  0x2d   :  { %350 = vmatpush.bf16.msra.mxu2 %v841_v25  ;;  %363 = vmatpush.bf16.msra.mxu3 %v905_v29  ;;  %v1009_v6 = vor.u32 %v1197_v5, %v1008_v4  ;;  %v1013_v10 = vor.u32 %v1196_v7, %v1010_v8  ;;  %v1056_v11 = vld [vmem:[#allocation4 + $0xc0] sm:$0xf]  ;;  %v1209_v12 = vld [vmem:[#allocation4 + $0xc4] sm:$0xf0]  ;;  %v1000_v14 = vld [vmem:[#allocation4 + $0x50] sm:$0xf] }
  0x2e   :  { %v1195_v15 = vld [vmem:[#allocation4 + $0x54] sm:$0xf0]  ;;  %v1194_v16 = vld [vmem:[#allocation4 + $0x54] sm:$0xf]  ;;  %v1208_v17 = vld [vmem:[#allocation4 + $0xc4] sm:$0xf]  ;;  %v1057_v23 = vor.u32 %v1209_v12, %v1056_v11 }
  0x2f   :  { %v1058_v18 = vld [vmem:[#allocation4 + $0xc8] sm:$0xf0]  ;;  %v1002_v19 = vld [vmem:[#allocation4 + $0x58] sm:$0xf0]  ;;  %v992_v22 = vld [vmem:[#allocation4 + $0x40] sm:$0xf] }
  0x30   :  { %375 = vmatpush.bf16.msrb.mxu0 %v853_v20  ;;  %388 = vmatpush.bf16.msrb.mxu1 %v917_v21  ;;  %v1001_v20 = vor.u32 %v1195_v15, %v1000_v14  ;;  %v1005_v21 = vor.u32 %v1194_v16, %v1002_v19  ;;  %v1193_v24 = vld [vmem:[#allocation4 + $0x44] sm:$0xf0]  ;;  %v1192_v25 = vld [vmem:[#allocation4 + $0x44] sm:$0xf]  ;;  %v994_v26 = vld [vmem:[#allocation4 + $0x48] sm:$0xf0]  ;;  %v1061_v27 = vor.u32 %v1208_v17, %v1058_v18 }
  0x31   :  { %351 = vmatpush.bf16.msra.mxu2 %v833_v37  ;;  %364 = vmatpush.bf16.msra.mxu3 %v897_v41  ;;  %v1048_v28 = vld [vmem:[#allocation4 + $0xb0] sm:$0xf]  ;;  %v1207_v29 = vld [vmem:[#allocation4 + $0xb4] sm:$0xf0]  ;;  %v1050_v31 = vld [vmem:[#allocation4 + $0xb8] sm:$0xf0]  ;;  %v993_v32 = vor.u32 %v1193_v24, %v992_v22 }
  0x32   :  { %v1049_v34 = vor.u32 %v1207_v29, %v1048_v28  ;;  %v1040_v36 = vld [vmem:[#allocation4 + $0xa0] sm:$0xf]  ;;  %v1205_v37 = vld [vmem:[#allocation4 + $0xa4] sm:$0xf0]  ;;  %v1204_v38 = vld [vmem:[#allocation4 + $0xa4] sm:$0xf] }
  0x33   :  { %v1042_v39 = vld [vmem:[#allocation4 + $0xa8] sm:$0xf0]  ;;  %v84_v40 = vld [vmem:[%s1419_s2] sm:$0x3]  ;;  %v1041_v41 = vor.u32 %v1205_v37, %v1040_v36  ;;  %v984_v55 = vld [vmem:[#allocation4 + $0x30] sm:$0xf] }
  0x34   :  { %376 = vmatpush.bf16.msrb.mxu0 %v845_v30  ;;  %389 = vmatpush.bf16.msrb.mxu1 %v909_v33  ;;  %v1206_v30 = vld [vmem:[#allocation4 + $0xb4] sm:$0xf]  ;;  %v997_v33 = vor.u32 %v1192_v25, %v994_v26  ;;  %v86_v43 = vperm.slane %v84_v40, 0  ;;  %v87_v44 = vperm.slane %v84_v40, 1  ;;  %v1191_v56 = vld [vmem:[#allocation4 + $0x34] sm:$0xf0] }
  0x35   :  { %611 = vmatpush.bf16.msrb.mxu3 %v1081_v49  ;;  %598 = vmatpush.bf16.msrb.mxu2 %v1017_v62  ;;  %v1053_v35 = vor.u32 %v1206_v30, %v1050_v31  ;;  %v985_v58 = vor.u32 %v1191_v56, %v984_v55  ;;  %v986_v59 = vld [vmem:[#allocation4 + $0x38] sm:$0xf0]  ;;  %v1203_v62 = vld [vmem:[#allocation4 + $0x94] sm:$0xf0]  ;;  %v976_v3 = vld [vmem:[#allocation4 + $0x20] sm:$0xf] }
  0x36   :  { %v1034_v1 = vld [vmem:[#allocation4 + $0x98] sm:$0xf0]  ;;  %v1189_v4 = vld [vmem:[#allocation4 + $0x24] sm:$0xf0]  ;;  %v1188_v5 = vld [vmem:[#allocation4 + $0x24] sm:$0xf] }
  0x37   :  { %v978_v7 = vld [vmem:[#allocation4 + $0x28] sm:$0xf0]  ;;  %v1200_v11 = vld [vmem:[#allocation4 + $0x84] sm:$0xf]  ;;  %v968_v15 = vld [vmem:[#allocation4 + $0x10] sm:$0xf] }
  0x38   :  { %377 = vmatpush.bf16.msrb.mxu0 %v837_v42  ;;  %390 = vmatpush.bf16.msrb.mxu1 %v901_v45  ;;  %v1045_v42 = vor.u32 %v1204_v38, %v1042_v39  ;;  %v981_v8 = vor.u32 %v1188_v5, %v978_v7  ;;  %v1187_v16 = vld [vmem:[#allocation4 + $0x14] sm:$0xf0]  ;;  %v1186_v18 = vld [vmem:[#allocation4 + $0x14] sm:$0xf]  ;;  %v970_v19 = vld [vmem:[#allocation4 + $0x18] sm:$0xf0] }
  0x39   :  { %612 = vmatpush.bf16.msrb.mxu3 %v1073_v57  ;;  %599 = vmatpush.bf16.msrb.mxu2 %v1009_v6  ;;  %v1190_v57 = vld [vmem:[#allocation4 + $0x34] sm:$0xf]  ;;  %v977_v6 = vor.u32 %v1189_v4, %v976_v3  ;;  %v969_v17 = vor.u32 %v1187_v16, %v968_v15  ;;  %v1185_v22 = vld [vmem:[#allocation4 + $0x4] sm:$0xf0]  ;;  %v962_v25 = vld [vmem:[#allocation4 + $0x8] sm:$0xf0] }
  0x3a   :  { %v989_v60 = vor.u32 %v1190_v57, %v986_v59  ;;  %v1223_v28 = vld [vmem:[#allocation6 + $0x38] sm:$0xff]  ;;  %v1230_v29 = vld [vmem:[#allocation6 + $0x70] sm:$0xff]  ;;  %v1229_v31 = vld [vmem:[#allocation6 + $0x68] sm:$0xff] }
  0x3b   :  { %v1222_v30 = vld [vmem:[#allocation6 + $0x30] sm:$0xff]  ;;  %v1219_v56 = vld [vmem:[#allocation6 + $0x18] sm:$0xff]  ;;  %v1225_v57 = vld [vmem:[#allocation6 + $0x48] sm:$0xff] }
  0x3c   :  { %637 = vmatpush.bf16.msra.mxu1 %v1085_v53  ;;  %624 = vmatpush.bf16.msra.mxu0 %v1021_v63  ;;  %v1202_v63 = vld [vmem:[#allocation4 + $0x94] sm:$0xf]  ;;  %v1224_v59 = vld [vmem:[#allocation6 + $0x40] sm:$0xff] }
  0x3d   :  { %613 = vmatpush.bf16.msrb.mxu3 %v1065_v9  ;;  %600 = vmatpush.bf16.msrb.mxu2 %v1001_v20  ;;  %v1037_v2 = vor.u32 %v1202_v63, %v1034_v1  ;;  %v1024_v9 = vld [vmem:[#allocation4 + $0x80] sm:$0xf]  ;;  %v973_v20 = vor.u32 %v1186_v18, %v970_v19  ;;  %v1226_v55 = vld [vmem:[#allocation6 + $0x50] sm:$0xff] }
  0x3e   :  { %v1239_v18 = vld [vmem:[%s1425_s8] ss:$0 sm:$0xff] }
  0x40   :  { %638 = vmatpush.bf16.msra.mxu1 %v1077_v61  ;;  %625 = vmatpush.bf16.msra.mxu0 %v1013_v10  ;;  %v1032_v61 = vld [vmem:[#allocation4 + $0x90] sm:$0xf]  ;;  %v1201_v10 = vld [vmem:[#allocation4 + $0x84] sm:$0xf0] }
  0x41   :  { %614 = vmatpush.bf16.msrb.mxu3 %v1057_v23  ;;  %601 = vmatpush.bf16.msrb.mxu2 %v993_v32  ;;  %v1033_v0 = vor.u32 %v1203_v62, %v1032_v61  ;;  %v1025_v12 = vor.u32 %v1201_v10, %v1024_v9  ;;  %v1184_v23 = vld [vmem:[#allocation4 + $0x4] sm:$0xf]  ;;  %v1221_v32 = vld [vmem:[#allocation6 + $0x28] sm:$0xff]  ;;  %v432_v62 = vld [vmem:[%s1423_s6] sm:$0x3] }
  0x42   :  { %v965_v26 = vor.u32 %v1184_v23, %v962_v25  ;;  %v1216_v61 = vld [vmem:[#allocation6] sm:$0xff] }
  0x44   :  { %639 = vmatpush.bf16.msra.mxu1 %v1069_v13  ;;  %626 = vmatpush.bf16.msra.mxu0 %v1005_v21  ;;  %v1026_v13 = vld [vmem:[#allocation4 + $0x88] sm:$0xf0]  ;;  %v960_v21 = vld [vmem:[#allocation4] sm:$0xf] }
  0x45   :  { %615 = vmatpush.bf16.msrb.mxu3 %v1049_v34  ;;  %602 = vmatpush.bf16.msrb.mxu2 %v985_v58  ;;  %v1029_v14 = vor.u32 %v1200_v11, %v1026_v13  ;;  %v961_v24 = vor.u32 %v1185_v22, %v960_v21  ;;  %v178_v34 = vld [vmem:[%s1421_s4] sm:$0x3]  ;;  %v1218_v58 = vld [vmem:[#allocation6 + $0x10] sm:$0xff] }
  0x46   :  { %v180_v39 = vperm.slane %v178_v34, 0 }
  0x48   :  { %640 = vmatpush.bf16.msra.mxu1 %v1061_v27  ;;  %627 = vmatpush.bf16.msra.mxu0 %v997_v33  ;;  %v1231_v27 = vld [vmem:[#allocation6 + $0x78] sm:$0xff]  ;;  %v1228_v33 = vld [vmem:[#allocation6 + $0x60] sm:$0xff] }
  0x49   :  { %616 = vmatpush.bf16.msrb.mxu3 %v1041_v41  ;;  %603 = vmatpush.bf16.msrb.mxu2 %v977_v6  ;;  %v434_v6 = vperm.slane %v432_v62, 0 }
  0x4c   :  { %641 = vmatpush.bf16.msra.mxu1 %v1053_v35  ;;  %628 = vmatpush.bf16.msra.mxu0 %v989_v60  ;;  %v181_v35 = vperm.slane %v178_v34, 1  ;;  %v1217_v60 = vld [vmem:[#allocation6 + $0x8] sm:$0xff] }
  0x4d   :  { %617 = vmatpush.bf16.msrb.mxu3 %v1033_v0  ;;  %604 = vmatpush.bf16.msrb.mxu2 %v969_v17  ;;  %v435_v0 = vperm.slane %v432_v62, 1 }
  0x50   :  { %642 = vmatpush.bf16.msra.mxu1 %v1045_v42  ;;  %629 = vmatpush.bf16.msra.mxu0 %v981_v8 }
  0x51   :  { %618 = vmatpush.bf16.msrb.mxu3 %v1025_v12  ;;  %605 = vmatpush.bf16.msrb.mxu2 %v961_v24 }
  0x54   :  { %643 = vmatpush.bf16.msra.mxu1 %v1037_v2  ;;  %630 = vmatpush.bf16.msra.mxu0 %v973_v20 }
  0x58   :  { %644 = vmatpush.bf16.msra.mxu1 %v1029_v14  ;;  %631 = vmatpush.bf16.msra.mxu0 %v965_v26 }
  0x98   :  { %v125_v45 = vpop.f32.mrf.mxu0  ;;  %v138_v46 = vpop.f32.mrf.mxu1 }
  0x99   :  { %v126_v47 = vadd.f32 %v125_v45, %v86_v43  ;;  %v139_v48 = vadd.f32 %v138_v46, %v87_v44 }
  0x9b   :  { %v142_v49 = vmax.f32 %v126_v47, 0.0  ;;  %v143_v50 = vmax.f32 %v139_v48, 0.0 }
  0x9d   :  { %v144_v51 = vpack.c.bf16 %v142_v49, %v142_v49  ;;  %v145_v52 = vpack.c.bf16 %v143_v50, %v143_v50 }
  0x9f   :  { %352 = vmatmul.bf16.vlgmr.msra.gmra.mxu2 %v144_v51  ;;  %365 = vmatmul.bf16.vlgmr.msra.gmra.mxu3 %v145_v52 }
  0xa0   :  { %378 = vmatmul.bf16.vlgmr.msrb.gmra.mxu0 %v144_v51  ;;  %391 = vmatmul.bf16.vlgmr.msrb.gmra.mxu1 %v145_v52  ;;  %v127_v53 = vpop.f32.mrf.mxu0  ;;  %v140_v54 = vpop.f32.mrf.mxu1 }
  0xa1   :  { %799 = vmatpush.bf16.msra.mxu3 %v1231_v27  ;;  %786 = vmatpush.bf16.msra.mxu2 %v1223_v28  ;;  %v1227_v53 = vld [vmem:[#allocation6 + $0x58] sm:$0xff]  ;;  %v1220_v54 = vld [vmem:[#allocation6 + $0x20] sm:$0xff] }
  0xa5   :  { %800 = vmatpush.bf16.msra.mxu3 %v1230_v29  ;;  %787 = vmatpush.bf16.msra.mxu2 %v1222_v30 }
  0xa9   :  { %801 = vmatpush.bf16.msra.mxu3 %v1229_v31  ;;  %788 = vmatpush.bf16.msra.mxu2 %v1221_v32 }
  0xad   :  { %802 = vmatpush.bf16.msra.mxu3 %v1228_v33  ;;  %789 = vmatpush.bf16.msra.mxu2 %v1220_v54 }
  0xb1   :  { %803 = vmatpush.bf16.msra.mxu3 %v1227_v53  ;;  %790 = vmatpush.bf16.msra.mxu2 %v1219_v56 }
  0xb5   :  { %804 = vmatpush.bf16.msra.mxu3 %v1226_v55  ;;  %791 = vmatpush.bf16.msra.mxu2 %v1218_v58 }
  0xb9   :  { %805 = vmatpush.bf16.msra.mxu3 %v1225_v57  ;;  %792 = vmatpush.bf16.msra.mxu2 %v1217_v60 }
  0xbd   :  { %806 = vmatpush.bf16.msra.mxu3 %v1224_v59  ;;  %793 = vmatpush.bf16.msra.mxu2 %v1216_v61 }
 0x11d   :  { %v379_v36 = vpop.f32.mrf.mxu0  ;;  %v392_v37 = vpop.f32.mrf.mxu1 }
 0x11e   :  { %v380_v38 = vadd.f32 %v379_v36, %v181_v35 }
 0x120   :  { %v393_v40 = vadd.f32 %v392_v37, %v380_v38 }
 0x122   :  { %v397_v41 = vmax.f32 %v393_v40, 0.0  ;;  %v353_v42 = vpop.f32.mrf.mxu2  ;;  %v366_v43 = vpop.f32.mrf.mxu3 }
 0x123   :  { %v354_v44 = vadd.f32 %v353_v42, %v180_v39 }
 0x124   :  { %v399_v45 = vpack.c.bf16 %v397_v41, %v397_v41 }
 0x125   :  { %v367_v46 = vadd.f32 %v366_v43, %v354_v44  ;;  %v381_v47 = vpop.f32.mrf.mxu0  ;;  %v394_v48 = vpop.f32.mrf.mxu1 }
 0x126   :  { %619 = vmatmul.bf16.vlgmr.msrb.gmra.mxu3 %v399_v45  ;;  %645 = vmatmul.bf16.vlgmr.msra.gmra.mxu1 %v399_v45 }
 0x127   :  { %v396_v49 = vmax.f32 %v367_v46, 0.0 }
 0x129   :  { %v398_v50 = vpack.c.bf16 %v396_v49, %v396_v49 }
 0x12a   :  { %v355_v51 = vpop.f32.mrf.mxu2  ;;  %v368_v52 = vpop.f32.mrf.mxu3 }
 0x12b   :  { %606 = vmatmul.bf16.vlgmr.msrb.gmra.mxu2 %v398_v50  ;;  %632 = vmatmul.bf16.vlgmr.msra.gmra.mxu0 %v398_v50 }
 0x1a3   :  { %v646_v63 = vpop.f32.mrf.mxu1 }
 0x1a8   :  { %v633_v1 = vpop.f32.mrf.mxu0 }
 0x1a9   :  { %v620_v2 = vpop.f32.mrf.mxu3  ;;  %v634_v3 = vadd.f32 %v633_v1, %v435_v0 }
 0x1ab   :  { %v647_v4 = vadd.f32 %v646_v63, %v634_v3  ;;  %v648_v5 = vpop.f32.mrf.mxu1 }
 0x1ad   :  { %v651_v7 = vmax.f32 %v647_v4, 0.0 }
 0x1ae   :  { %v607_v8 = vpop.f32.mrf.mxu2 }
 0x1af   :  { %v653_v9 = vpack.c.bf16 %v651_v7, %v651_v7  ;;  %v608_v10 = vadd.f32 %v607_v8, %v434_v6 }
 0x1b0   :  { %v635_v11 = vpop.f32.mrf.mxu0 }
 0x1b1   :  { %v621_v12 = vadd.f32 %v620_v2, %v608_v10  ;;  %v622_v13 = vpop.f32.mrf.mxu3  ;;  %807 = vmatmul.bf16.vlgmr.msra.gmra.mxu3 %v653_v9 }
 0x1b3   :  { %v650_v14 = vmax.f32 %v621_v12, 0.0 }
 0x1b5   :  { %v652_v15 = vpack.c.bf16 %v650_v14, %v650_v14 }
 0x1b6   :  { %v609_v16 = vpop.f32.mrf.mxu2 }
 0x1b7   :  { %794 = vmatmul.bf16.vlgmr.msra.gmra.mxu2 %v652_v15 }
 0x234   :  { %v808_v17 = vpop.f32.mrf.mxu3 }
 0x23a   :  { %v795_v19 = vpop.f32.mrf.mxu2 }
 0x23b   :  { %v796_v20 = vadd.f32 %v1239_v18, %v795_v19 }
 0x23c   :  { %v810_v21 = vpop.f32.mrf.mxu3 }
 0x23d   :  { %v809_v22 = vadd.f32 %v808_v17, %v796_v20 }
 0x23f   :  { %v812_v23 = vpack.c.bf16 %v809_v22, %v809_v22 }
 0x241   :  { %813 = vst [vmem:[%s1426_s9] sm:$0xf] %v812_v23 }
 0x242   :  { %v797_v24 = vpop.f32.mrf.mxu2 }
 0x243   :  { %818 = vsyncpa [#allocation3], 1 }
 0x244   :  { %819 = vsyncpa [#allocation5], 1 }

</bundles_post_ra>
